<compile_context>
chip_gen: v6e
topology: v6e:2x2x1
jax: 0.10.0
libtpu: 0.0.40
codegen_flags: <defaults>
</compile_context>

<pallas_src>
import jax
import jax.numpy as jnp
from jax.experimental import pallas as pl
from jax.experimental.pallas import tpu as pltpu


PAD = 128            # lane-dense padded width for In / H / Out
# Packed parameter slab layout (rows, all widths padded to PAD columns):
#   [  0:128)  w1  (In x H   in top-left corner, rest zeros)
#   [128:136)  b1  (row 128 holds the bias, rest zeros)   -- 8-row aligned pad
#   [136:264)  w2  (H x Out  in top-left corner, rest zeros)
#   [264:272)  b2  (row 264 holds the bias, rest zeros)
_W1_LO, _W1_HI = 0, PAD
_B1_ROW = PAD                      # 128
_W2_LO, _W2_HI = PAD + 8, 2 * PAD + 8   # 136 .. 264
_B2_ROW = 2 * PAD + 8              # 264
_SLAB_ROWS = 2 * PAD + 16          # 272


def _qnet_kernel(x_ref, p_ref, out_ref):
    # Fused MLP: matmul + bias + ReLU + matmul + bias, all lane-dense (128).
    x = x_ref[...]                                   # (B, 128)
    w1 = p_ref[_W1_LO:_W1_HI, :]                     # (128, 128)
    b1 = p_ref[_B1_ROW:_B1_ROW + 1, :]               # (1, 128)
    w2 = p_ref[_W2_LO:_W2_HI, :]                     # (128, 128)
    b2 = p_ref[_B2_ROW:_B2_ROW + 1, :]               # (1, 128)

    h = jnp.dot(x, w1, preferred_element_type=jnp.float32) + b1
    h = jnp.maximum(h, 0.0)                          # ReLU (f32 VPU path)
    o = jnp.dot(h, w2, preferred_element_type=jnp.float32) + b2
    out_ref[...] = o.astype(out_ref.dtype)           # (B, 128) lane-dense store


def pack_params(w1, b1, w2, b2):
    """Pack (In,H)/(H,)/(H,Out)/(Out,) params into one zero-padded f32 slab."""
    In, H = w1.shape
    H2, Out = w2.shape
    assert H2 == H
    slab = jnp.zeros((_SLAB_ROWS, PAD), jnp.float32)
    slab = slab.at[:In, :H].set(w1.astype(jnp.float32))
    slab = slab.at[_B1_ROW, :H].set(b1.reshape(-1).astype(jnp.float32))
    slab = slab.at[_W2_LO:_W2_LO + H, :Out].set(w2.astype(jnp.float32))
    slab = slab.at[_B2_ROW, :Out].set(b2.reshape(-1).astype(jnp.float32))
    return slab


def linear_qnet_forward(x, param_slab, out_size):
    """x: (B, In) f32; param_slab: (272, 128) f32 from pack_params."""
    B, In = x.shape
    # Zero-pad the input features up to the lane-dense width.
    x_pad = jnp.zeros((B, PAD), jnp.float32).at[:, :In].set(x.astype(jnp.float32))

    out_full = pl.pallas_call(
        _qnet_kernel,
        out_shape=jax.ShapeDtypeStruct((B, PAD), jnp.float32),
        # Single invocation (no grid): whole arrays resident in VMEM.
        in_specs=[
            pl.BlockSpec(memory_space=pltpu.MemorySpace.VMEM),
            pl.BlockSpec(memory_space=pltpu.MemorySpace.VMEM),
        ],
        out_specs=pl.BlockSpec(memory_space=pltpu.MemorySpace.VMEM),
    )(x_pad, param_slab)
    return out_full[:, :out_size]


def init_params(key, input_size, hidden_size, output_size):
    """Deterministic init mimicking PyTorch nn.Linear (uniform +-1/sqrt(fan_in)).
    Weights stored as (in, out) == PyTorch W.T so the kernel does plain matmuls."""
    k1, k2, k3, k4 = jax.random.split(key, 4)
    lim1 = 1.0 / jnp.sqrt(jnp.float32(input_size))
    lim2 = 1.0 / jnp.sqrt(jnp.float32(hidden_size))
    w1 = jax.random.uniform(k1, (input_size, hidden_size), jnp.float32, -lim1, lim1)
    b1 = jax.random.uniform(k2, (hidden_size,), jnp.float32, -lim1, lim1)
    w2 = jax.random.uniform(k3, (hidden_size, output_size), jnp.float32, -lim2, lim2)
    b2 = jax.random.uniform(k4, (output_size,), jnp.float32, -lim2, lim2)
    return w1, b1, w2, b2


if __name__ == "__main__":
    # Snake Q-net shapes: 11 state features -> 32 hidden -> 3 actions.
    batch, input_size, hidden_size, output_size = 2, 11, 32, 3

    key = jax.random.PRNGKey(0)
    kx, kp = jax.random.split(key)
    x = jax.random.normal(kx, (batch, input_size), dtype=jnp.float32)
    w1, b1, w2, b2 = init_params(kp, input_size, hidden_size, output_size)

    slab = pack_params(w1, b1, w2, b2)
    out = linear_qnet_forward(x, slab, output_size)
    out = jax.block_until_ready(out)

    # Pure-JAX reference (same semantics as the PyTorch forward).
    ref = jnp.maximum(x @ w1 + b1[None, :], 0.0) @ w2 + b2[None, :]
    assert out.shape == (batch, output_size)
    assert jnp.allclose(out, ref, atol=1e-5, rtol=1e-5), (out, ref)

    print("KERNEL_OK")
</pallas_src>

<mosaic_0001>
module attributes {stable_mosaic.version = 11 : i64} {
  func.func @_qnet_kernel(%arg0: memref<2x128xf32, #tpu.memory_space<vmem>>, %arg1: memref<272x128xf32, #tpu.memory_space<vmem>>, %arg2: memref<2x128xf32, #tpu.memory_space<vmem>>) attributes {dimension_semantics = [], scalar_prefetch = 0 : i64, scratch_operands = 0 : i64, tpu.core_type = #tpu.core_type<tc>} {
    %c0 = arith.constant 0 : index
    %c0_0 = arith.constant 0 : index
    %0 = vector.load %arg0[%c0, %c0_0] : memref<2x128xf32, #tpu.memory_space<vmem>>, vector<2x128xf32>
    %c0_1 = arith.constant 0 : index
    %c0_2 = arith.constant 0 : index
    %1 = vector.load %arg1[%c0_1, %c0_2] : memref<272x128xf32, #tpu.memory_space<vmem>>, vector<128x128xf32>
    %c128 = arith.constant 128 : index
    %c0_3 = arith.constant 0 : index
    %2 = vector.load %arg1[%c128, %c0_3] : memref<272x128xf32, #tpu.memory_space<vmem>>, vector<1x128xf32>
    %c136 = arith.constant 136 : index
    %c0_4 = arith.constant 0 : index
    %3 = vector.load %arg1[%c136, %c0_4] : memref<272x128xf32, #tpu.memory_space<vmem>>, vector<128x128xf32>
    %c264 = arith.constant 264 : index
    %c0_5 = arith.constant 0 : index
    %4 = vector.load %arg1[%c264, %c0_5] : memref<272x128xf32, #tpu.memory_space<vmem>>, vector<1x128xf32>
    %cst = arith.constant dense<0.000000e+00> : vector<2x128xf32>
    %5 = tpu.matmul %0, %1, %cst {dimension_numbers = #tpu.dot_dimension_numbers<[1], [0], [0], [1], [0, 0, 1, 1], [], []>} : vector<2x128xf32>, vector<128x128xf32>, vector<2x128xf32> -> vector<2x128xf32>
    %6 = vector.broadcast %2 : vector<1x128xf32> to vector<2x128xf32>
    %7 = arith.addf %5, %6 : vector<2x128xf32>
    %cst_6 = arith.constant 0.000000e+00 : f32
    %8 = vector.broadcast %cst_6 : f32 to vector<2x128xf32>
    %9 = arith.maximumf %7, %8 : vector<2x128xf32>
    %cst_7 = arith.constant dense<0.000000e+00> : vector<2x128xf32>
    %10 = tpu.matmul %9, %3, %cst_7 {dimension_numbers = #tpu.dot_dimension_numbers<[1], [0], [0], [1], [0, 0, 1, 1], [], []>} : vector<2x128xf32>, vector<128x128xf32>, vector<2x128xf32> -> vector<2x128xf32>
    %11 = vector.broadcast %4 : vector<1x128xf32> to vector<2x128xf32>
    %12 = arith.addf %10, %11 : vector<2x128xf32>
    %c0_8 = arith.constant 0 : index
    %c0_9 = arith.constant 0 : index
    %13 = vector.load %arg2[%c0_8, %c0_9] : memref<2x128xf32, #tpu.memory_space<vmem>>, vector<2x128xf32>
    tpu.vector_store %arg2[%c0_8, %c0_9], %12 {strides = array<i32>} : memref<2x128xf32, #tpu.memory_space<vmem>>, vector<2x128xf32>,
    return
  }
}

</mosaic_0001>

<bundles_post_ra>
// kernel: tpu_custom_call.1
= control target key start
LH: loop header
LB: loop body
LE: loop exit
PB: predicated region body
PF: predicated region fallthrough
CT: control target
= control target key end

     0   :  { %7 = vsyncpa [#allocation3], 0  ;;  %s483_s0 = inlined_call_operand.hbm [shape: f32[2,128], index: 0, kind: input, shape index: {}]   ;;  %s484_s1 = inlined_call_operand.hbm [shape: f32[272,128], index: 1, kind: input, shape index: {}]   ;;  %s485_s2 = inlined_call_operand.hbm [shape: f32[2,128], index: 2, kind: output, shape index: {}]  }
   0x1   :  { %8 = vsyncpa [#allocation6], 0 }
   0x2   :  { %9 = vsyncpa [#allocation4], 0  ;;  %s418_s9 = smov [#allocation2]   ;;  %s419_s11 = smov [#allocation5]  }
   0x3   :  { %s16_s10 = sshll.u32 %s418_s9, 4  ;;  %s25_s12 = sshll.u32 %s419_s11, 4  ;;  %s17_s10 = int_to_ptr.vmem [resolvable:$true] %s16_s10  ;;  %s26_s12 = int_to_ptr.vmem [resolvable:$true] %s25_s12 }
   0x4   :  { %s360_s13 = scalar_lea.vmem %s17_s10, 32  ;;  %p365_p1 = scmp.lt.s32.totalorder %s17_s10, %s17_s10 }
   0x5   :  { %p361_p0 = scmp.ne.s32.totalorder %s17_s10, %s360_s13  ;;  %p366_p2 = scmp.lt.s32.totalorder %s360_s13, %s360_s13 }
   0x7   :  { %p367_p3 = por %p366_p2, %p365_p1 }
   0x9   :  { %p368_p4 = pnand %p367_p3, %p361_p0 }
   0xb   :  { %371 = shalt.err (!%p368_p4)
}
   0xc   :  { %19 = dma.hbm_to_vmem [thread:$0]  %s483_s0, 32, %s17_s10, [#allocation3]  }
   0xd   :  { %s380_s16 = scalar_lea.vmem %s26_s12, 4352  ;;  %p385_p6 = scmp.lt.s32.totalorder %s26_s12, %s26_s12 }
   0xe   :  { %p381_p5 = scmp.ne.s32.totalorder %s26_s12, %s380_s16  ;;  %p386_p7 = scmp.lt.s32.totalorder %s380_s16, %s380_s16 }
  0x10   :  { %p387_p8 = por %p386_p7, %p385_p6 }
  0x12   :  { %p388_p9 = pnand %p387_p8, %p381_p5 }
  0x14   :  { %391 = shalt.err (!%p388_p9)
}
  0x15   :  { %s420_s17 = smov 128   ;;  %s421_s18 = smov 8  }
  0x16   :  { %31 = dma.hbm_to_vmem [thread:$0]  %s484_s1, 4352, %s26_s12, [#allocation6], %s420_s17, %s420_s17, %s421_s18  }
  0x17   :  { %412 = dma.done.wait [#allocation3], 32  }
  0x18   :  { %413 = vsyncadd [#allocation3], 4294967264 }
  0x19   :  { %414 = dma.done.wait [#allocation6], 4352  }
  0x1a   :  { %415 = vsyncadd [#allocation6], 4294962944  ;;  %v422_v0 = vmov 0.0   ;;  %vm423_vm0 = vmmov 0   ;;  %v54_v1 = vld [vmem:[#allocation5 + $0x78] sm:$0xff]  ;;  %v53_v2 = vld [vmem:[#allocation5 + $0x70] sm:$0xff] }
  0x1b   :  { %275 = vmatprep.subr.mxu0 %v422_v0  ;;  %307 = vmatprep.mubr.msk.f32.mxu0 %vm423_vm0, %v422_v0  ;;  %v52_v3 = vld [vmem:[#allocation5 + $0x68] sm:$0xff]  ;;  %v51_v4 = vld [vmem:[#allocation5 + $0x60] sm:$0xff]  ;;  %v50_v6 = vld [vmem:[#allocation5 + $0x58] sm:$0xff]  ;;  %s424_s0 = smov [#allocation7]  }
  0x1c   :  { %310 = vmatprep.subr.mxu1 %v422_v0  ;;  %342 = vmatprep.mubr.msk.f32.mxu1 %vm423_vm0, %v422_v0  ;;  %v71_v5 = vld [vmem:[#allocation5 + $0x100] sm:$0xff]  ;;  %v70_v7 = vld [vmem:[#allocation5 + $0xf8] sm:$0xff]  ;;  %v69_v8 = vld [vmem:[#allocation5 + $0xf0] sm:$0xff]  ;;  %s229_s1 = sshll.u32 %s424_s0, 4  ;;  %s230_s1 = int_to_ptr.vmem [resolvable:$true] %s229_s1 }
  0x1d   :  { %276 = vmatpush3.msra.mxu0 %v54_v1  ;;  %311 = vmatpush3.msra.mxu1 %v71_v5  ;;  %v49_v9 = vld [vmem:[#allocation5 + $0x50] sm:$0xff]  ;;  %v68_v10 = vld [vmem:[#allocation5 + $0xe8] sm:$0xff]  ;;  %v67_v12 = vld [vmem:[#allocation5 + $0xe0] sm:$0xff]  ;;  %s392_s21 = scalar_lea.vmem %s230_s1, 32  ;;  %p397_p11 = scmp.lt.s32.totalorder %s230_s1, %s230_s1 }
  0x1e   :  { %277 = vmatprep.subr.mxu0 %v422_v0  ;;  %312 = vmatprep.subr.mxu1 %v422_v0  ;;  %v48_v11 = vld [vmem:[#allocation5 + $0x48] sm:$0xff]  ;;  %v47_v13 = vld [vmem:[#allocation5 + $0x40] sm:$0xff]  ;;  %v66_v14 = vld [vmem:[#allocation5 + $0xd8] sm:$0xff]  ;;  %p393_p10 = scmp.ne.s32.totalorder %s230_s1, %s392_s21  ;;  %p398_p12 = scmp.lt.s32.totalorder %s392_s21, %s392_s21 }
  0x1f   :  { %278 = vmatpush3.msra.mxu0 %v53_v2  ;;  %313 = vmatpush3.msra.mxu1 %v70_v7  ;;  %v46_v15 = vld [vmem:[#allocation5 + $0x38] sm:$0xff]  ;;  %v65_v16 = vld [vmem:[#allocation5 + $0xd0] sm:$0xff]  ;;  %v64_v18 = vld [vmem:[#allocation5 + $0xc8] sm:$0xff] }
  0x20   :  { %279 = vmatprep.subr.mxu0 %v422_v0  ;;  %314 = vmatprep.subr.mxu1 %v422_v0  ;;  %v45_v17 = vld [vmem:[#allocation5 + $0x30] sm:$0xff]  ;;  %v44_v19 = vld [vmem:[#allocation5 + $0x28] sm:$0xff]  ;;  %v63_v20 = vld [vmem:[#allocation5 + $0xc0] sm:$0xff]  ;;  %p399_p13 = por %p398_p12, %p397_p11 }
  0x21   :  { %280 = vmatpush3.msra.mxu0 %v52_v3  ;;  %315 = vmatpush3.msra.mxu1 %v69_v8  ;;  %v43_v21 = vld [vmem:[#allocation5 + $0x20] sm:$0xff]  ;;  %v62_v22 = vld [vmem:[#allocation5 + $0xb8] sm:$0xff]  ;;  %v61_v24 = vld [vmem:[#allocation5 + $0xb0] sm:$0xff] }
  0x22   :  { %281 = vmatprep.subr.mxu0 %v422_v0  ;;  %316 = vmatprep.subr.mxu1 %v422_v0  ;;  %v42_v23 = vld [vmem:[#allocation5 + $0x18] sm:$0xff]  ;;  %v41_v25 = vld [vmem:[#allocation5 + $0x10] sm:$0xff]  ;;  %v60_v26 = vld [vmem:[#allocation5 + $0xa8] sm:$0xff]  ;;  %p400_p0 = pnand %p399_p13, %p393_p10 }
  0x23   :  { %282 = vmatpush3.msra.mxu0 %v51_v4  ;;  %317 = vmatpush3.msra.mxu1 %v68_v10  ;;  %v40_v27 = vld [vmem:[#allocation5 + $0x8] sm:$0xff]  ;;  %v59_v28 = vld [vmem:[#allocation5 + $0xa0] sm:$0xff]  ;;  %v38_v30 = vld [vmem:[#allocation2] sm:$0x3] }
  0x24   :  { %283 = vmatprep.subr.mxu0 %v422_v0  ;;  %318 = vmatprep.subr.mxu1 %v422_v0  ;;  %v39_v29 = vld [vmem:[#allocation5] sm:$0xff]  ;;  %v58_v31 = vld [vmem:[#allocation5 + $0x98] sm:$0xff]  ;;  %v57_v32 = vld [vmem:[#allocation5 + $0x90] sm:$0xff] }
  0x25   :  { %284 = vmatpush3.msra.mxu0 %v50_v6  ;;  %319 = vmatpush3.msra.mxu1 %v67_v12  ;;  %v56_v33 = vld [vmem:[#allocation5 + $0x88] sm:$0xff]  ;;  %v239_v34 = vld [vmem:[#allocation5 + $0x80] ss:$0 sm:$0xff] }
  0x26   :  { %285 = vmatprep.subr.mxu0 %v422_v0  ;;  %320 = vmatprep.subr.mxu1 %v422_v0  ;;  %v240_v39 = vld [vmem:[#allocation5 + $0x108] ss:$0 sm:$0xff] }
  0x27   :  { %286 = vmatpush3.msra.mxu0 %v49_v9  ;;  %321 = vmatpush3.msra.mxu1 %v66_v14 }
  0x28   :  { %287 = vmatprep.subr.mxu0 %v422_v0  ;;  %322 = vmatprep.subr.mxu1 %v422_v0 }
  0x29   :  { %288 = vmatpush3.msra.mxu0 %v48_v11  ;;  %323 = vmatpush3.msra.mxu1 %v65_v16 }
  0x2a   :  { %289 = vmatprep.subr.mxu0 %v422_v0  ;;  %324 = vmatprep.subr.mxu1 %v422_v0 }
  0x2b   :  { %290 = vmatpush3.msra.mxu0 %v47_v13  ;;  %325 = vmatpush3.msra.mxu1 %v64_v18 }
  0x2c   :  { %291 = vmatprep.subr.mxu0 %v422_v0  ;;  %326 = vmatprep.subr.mxu1 %v422_v0 }
  0x2d   :  { %292 = vmatpush3.msra.mxu0 %v46_v15  ;;  %327 = vmatpush3.msra.mxu1 %v63_v20 }
  0x2e   :  { %293 = vmatprep.subr.mxu0 %v422_v0  ;;  %328 = vmatprep.subr.mxu1 %v422_v0 }
  0x2f   :  { %294 = vmatpush3.msra.mxu0 %v45_v17  ;;  %329 = vmatpush3.msra.mxu1 %v62_v22 }
  0x30   :  { %295 = vmatprep.subr.mxu0 %v422_v0  ;;  %330 = vmatprep.subr.mxu1 %v422_v0 }
  0x31   :  { %296 = vmatpush3.msra.mxu0 %v44_v19  ;;  %331 = vmatpush3.msra.mxu1 %v61_v24 }
  0x32   :  { %297 = vmatprep.subr.mxu0 %v422_v0  ;;  %332 = vmatprep.subr.mxu1 %v422_v0 }
  0x33   :  { %298 = vmatpush3.msra.mxu0 %v43_v21  ;;  %333 = vmatpush3.msra.mxu1 %v60_v26 }
  0x34   :  { %299 = vmatprep.subr.mxu0 %v422_v0  ;;  %334 = vmatprep.subr.mxu1 %v422_v0 }
  0x35   :  { %300 = vmatpush3.msra.mxu0 %v42_v23  ;;  %335 = vmatpush3.msra.mxu1 %v59_v28 }
  0x36   :  { %301 = vmatprep.subr.mxu0 %v422_v0  ;;  %336 = vmatprep.subr.mxu1 %v422_v0 }
  0x37   :  { %302 = vmatpush3.msra.mxu0 %v41_v25  ;;  %337 = vmatpush3.msra.mxu1 %v58_v31 }
  0x38   :  { %303 = vmatprep.subr.mxu0 %v422_v0  ;;  %338 = vmatprep.subr.mxu1 %v422_v0 }
  0x39   :  { %304 = vmatpush3.msra.mxu0 %v40_v27  ;;  %339 = vmatpush3.msra.mxu1 %v57_v32 }
  0x3a   :  { %305 = vmatprep.subr.mxu0 %v422_v0  ;;  %340 = vmatprep.subr.mxu1 %v422_v0 }
  0x3b   :  { %306 = vmatpush3.msra.mxu0 %v39_v29  ;;  %341 = vmatpush3.msra.mxu1 %v56_v33 }
  0x3c   :  { %308 = vmatmul.mubr.f32.vlgmr.msra.gmra.mxu0 %v38_v30 }
  0xfc   :  { %v143_v35 = vpop.f32.mrf.mxu0 }
  0xfd   :  { %v144_v36 = vadd.f32 %v239_v34, %v143_v35 }
  0xfe   :  { %v309_v37 = vpop.f32.mrf.mxu0 }
  0xff   :  { %v147_v38 = vmax.f32 %v144_v36, 0.0 }
 0x101   :  { %343 = vmatmul.mubr.f32.vlgmr.msra.gmra.mxu1 %v147_v38 }
 0x1c1   :  { %v218_v40 = vpop.f32.mrf.mxu1 }
 0x1c2   :  { %v219_v41 = vadd.f32 %v240_v39, %v218_v40 }
 0x1c3   :  { %v344_v42 = vpop.f32.mrf.mxu1 }
 0x1c4   :  { %222 = vst [vmem:[#allocation7] sm:$0x3] %v219_v41 }
 0x1c5   :  { %403 = shalt.err (!%p400_p0)
}
 0x1c6   :  { %232 = dma.vmem_to_hbm [thread:$0]  %s230_s1, 32, %s485_s2, [#allocation4]  }
 0x1c7   :  { %416 = dma.done.wait [#allocation4], 32  }
 0x1c8   :  { %417 = vsyncadd [#allocation4], 4294967264 }
 0x1c9   :  { %236 = vsyncpa [#allocation3], 1 }
 0x1ca   :  { %237 = vsyncpa [#allocation6], 1 }
 0x1cb   :  { %238 = vsyncpa [#allocation4], 1 }

</bundles_post_ra>
